<compile_context>
chip_gen: v7x
topology: tpu7x:2x2x1
jax: 0.10.0
libtpu: 0.0.40
codegen_flags: <defaults>
</compile_context>

<pallas_src>
import jax
import jax.numpy as jnp
from jax.experimental import pallas as pl
from jax.experimental.pallas import tpu as pltpu


# --------------------------------------------------------------------------------------
# Kernel
# --------------------------------------------------------------------------------------
def combined_adapter_kernel(x_ref,
                            w1a_ref, b1a_ref, w2a_ref, b2a_ref,
                            w1b_ref, b1b_ref, w2b_ref, b2b_ref,
                            o_ref):
    """Fused CombinedModel forward on one row tile: adapter2(adapter1(x.float())).half()."""
    x = x_ref[...].astype(jnp.float32)            # exact upcast from fp16/bf16; no-op for f32

    def adapter(inp_f32, w1_ref, b1_ref, w2_ref, b2_ref):
        # down-projection: bf16 MXU inputs, f32 accumulation
        h = jnp.dot(inp_f32.astype(jnp.bfloat16), w1_ref[...],
                    preferred_element_type=jnp.float32)           # (TILE_M, mid_pad)
        h = jnp.maximum(h + b1_ref[...], 0.0)                     # bias + ReLU in f32 (VPU)
        # up-projection
        d = jnp.dot(h.astype(jnp.bfloat16), w2_ref[...],
                    preferred_element_type=jnp.float32)           # (TILE_M, f_pad)
        return d + b2_ref[...] + inp_f32                          # bias + residual in f32

    y1 = adapter(x, w1a_ref, b1a_ref, w2a_ref, b2a_ref)           # submodel1
    y2 = adapter(y1, w1b_ref, b1b_ref, w2b_ref, b2b_ref)          # submodel2

    f_out = o_ref.shape[-1]                                        # drop zero padded lanes in-kernel
    o_ref[...] = y2[:, :f_out].astype(o_ref.dtype)                 # ".half()" store


# --------------------------------------------------------------------------------------
# Helpers
# --------------------------------------------------------------------------------------
def _round_up(n, m):
    return ((n + m - 1) // m) * m


def _vmem_capacity_bytes():
    """Generation-aware VMEM capacity (128 MiB v5e/v6e, 64 MiB/TC v7x)."""
    try:
        return int(pltpu.get_tpu_info().vmem_capacity_bytes)
    except Exception:
        return 64 * 1024 * 1024                   # v7x per-TC floor; safe on every generation


def _pad_adapter_params(w1, b1, w2, b2, f_pad, mid_pad):
    """Zero-pad to lane-aligned shapes; weights -> bf16 (MXU inputs), biases -> f32."""
    f, mid = w1.shape
    if f == f_pad and mid == mid_pad:             # aligned: casts only, no pad copies
        return (w1.astype(jnp.bfloat16), b1.astype(jnp.float32),
                w2.astype(jnp.bfloat16), b2.astype(jnp.float32))
    w1p = jnp.zeros((f_pad, mid_pad), jnp.bfloat16).at[:f, :mid].set(w1.astype(jnp.bfloat16))
    b1p = jnp.zeros((1, mid_pad), jnp.float32).at[:, :mid].set(b1.astype(jnp.float32))
    w2p = jnp.zeros((mid_pad, f_pad), jnp.bfloat16).at[:mid, :f].set(w2.astype(jnp.bfloat16))
    b2p = jnp.zeros((1, f_pad), jnp.float32).at[:, :f].set(b2.astype(jnp.float32))
    return w1p, b1p, w2p, b2p


def _pick_tile_m(m, f_pad, mid_pad, x_itemsize, out_itemsize, weight_bytes):
    """Largest row tile that honestly fits VMEM on the current generation."""
    budget = int(_vmem_capacity_bytes() * 0.70)   # headroom under the scoped limit
    # Per-row VMEM: double-buffered in/out tiles + in-kernel temporaries
    # (x_f32, y1, d in f32 and the bf16 MXU copies; ~16*f + 8*mid bytes/row, conservative).
    per_row = 2 * (x_itemsize + out_itemsize) * f_pad + 16 * f_pad + 8 * mid_pad
    # Weights use constant index_maps but the pipeliner still double-buffers them.
    # TODO(synk): pipeline_mode=pl.Buffered(1) on the weight specs would free weight_bytes.
    avail = max(budget - 2 * weight_bytes, per_row * 8)
    tile = min(avail // per_row, 4096)
    if tile >= 256:
        tile = (tile // 256) * 256                # MXU-friendly multiple (v6e/v7x 256-wide feed)
    else:
        tile = max(8, (tile // 8) * 8)            # sublane-aligned floor
    if m >= 32:                                   # keep >=4 grid steps: 2 TCs x double-buffer (v7x)
        tile = min(tile, max(8, ((-(-m // 4)) // 8) * 8))
    tile = min(tile, _round_up(m, 8))             # never taller than the (rounded) problem
    return int(tile)


# --------------------------------------------------------------------------------------
# Wrapper
# --------------------------------------------------------------------------------------
def combined_forward(x, params1, params2, *, tile_m=None, out_dtype=jnp.bfloat16):
    """CombinedModel forward: x -> f32 -> adapter1 -> adapter2 -> half-precision output."""
    orig_shape = x.shape
    f = orig_shape[-1]
    x2d = x.reshape(-1, f)                        # native dtype (2 B reads for bf16/fp16 inputs)
    m = x2d.shape[0]
    mid = params1[0].shape[1]

    f_pad = _round_up(f, 128)                     # no-op for common hidden sizes (4096, ...)
    mid_pad = _round_up(mid, 128)                 # one lane group only (mem-bound: MXU cols free)

    p1 = _pad_adapter_params(*params1, f_pad, mid_pad)
    p2 = _pad_adapter_params(*params2, f_pad, mid_pad)
    weight_bytes = sum(int(a.size) * a.dtype.itemsize for a in (*p1, *p2))

    if f_pad != f:                                # slow path: lane-unaligned hidden size only
        x2d = jnp.pad(x2d, ((0, 0), (0, f_pad - f)))

    out_itemsize = jnp.dtype(out_dtype).itemsize
    if tile_m is None:
        tile_m = _pick_tile_m(m, f_pad, mid_pad, x2d.dtype.itemsize, out_itemsize, weight_bytes)

    grid = (pl.cdiv(m, tile_m),)                  # ragged last tile handled by clipped block DMA

    x_spec = pl.BlockSpec((tile_m, f_pad), lambda i: (i, 0))       # tiled, pipelined
    out_spec = pl.BlockSpec((tile_m, f), lambda i: (i, 0))         # final shape, no wrapper slice
    resident = lambda arr: pl.BlockSpec(arr.shape, lambda i: (0, 0))  # DMA'd once, stays in VMEM

    flops = 8 * m * f_pad * mid_pad               # 4 matmuls, 2*M*F*mid each
    bytes_accessed = (m * f_pad * x2d.dtype.itemsize      # activation read (native dtype)
                      + m * f * out_itemsize              # half-precision writeback
                      + weight_bytes)

    out = pl.pallas_call(
        combined_adapter_kernel,
        out_shape=jax.ShapeDtypeStruct((m, f), out_dtype),
        grid=grid,
        in_specs=[
            x_spec,                                                            # x
            resident(p1[0]), resident(p1[1]), resident(p1[2]), resident(p1[3]),  # adapter 1
            resident(p2[0]), resident(p2[1]), resident(p2[2]), resident(p2[3]),  # adapter 2
        ],
        out_specs=out_spec,
        compiler_params=pltpu.CompilerParams(
            dimension_semantics=("parallel",),            # shards rows across TCs on v7x
            vmem_limit_bytes=int(_vmem_capacity_bytes() * 0.85),
        ),
        cost_estimate=pl.CostEstimate(
            flops=int(flops), transcendentals=0, bytes_accessed=int(bytes_accessed)),
    )(x2d, *p1, *p2)

    return out.reshape(orig_shape)


# --------------------------------------------------------------------------------------
# Parameter init (mimics nn.Linear uniform init; weights stored pre-transposed for x @ W)
# --------------------------------------------------------------------------------------
def init_adapter_params(key, in_features, mid_features, dtype=jnp.float32):
    k1, k2, k3, k4 = jax.random.split(key, 4)
    bound1 = 1.0 / (in_features ** 0.5)
    bound2 = 1.0 / (mid_features ** 0.5)
    w1 = jax.random.uniform(k1, (in_features, mid_features), dtype, -bound1, bound1)
    b1 = jax.random.uniform(k2, (1, mid_features), dtype, -bound1, bound1)
    w2 = jax.random.uniform(k3, (mid_features, in_features), dtype, -bound2, bound2)
    b2 = jax.random.uniform(k4, (1, in_features), dtype, -bound2, bound2)
    return w1, b1, w2, b2


# --------------------------------------------------------------------------------------
# Pure-JAX reference matching the kernel's numerics (bf16 MXU inputs, f32 accumulate/elementwise)
# --------------------------------------------------------------------------------------
def _adapter_ref(x_f32, w1, b1, w2, b2):
    h = jnp.dot(x_f32.astype(jnp.bfloat16), w1.astype(jnp.bfloat16),
                preferred_element_type=jnp.float32)
    h = jnp.maximum(h + b1.astype(jnp.float32), 0.0)
    d = jnp.dot(h.astype(jnp.bfloat16), w2.astype(jnp.bfloat16),
                preferred_element_type=jnp.float32)
    return d + b2.astype(jnp.float32) + x_f32


def combined_ref(x, params1, params2):
    x_f32 = x.astype(jnp.float32)
    y1 = _adapter_ref(x_f32, *params1)
    y2 = _adapter_ref(y1, *params2)
    return y2  # f32 (compare kernel's half-precision output against this)


# --------------------------------------------------------------------------------------
if __name__ == "__main__":
    key = jax.random.PRNGKey(0)

    # Case 1: spec-suggested small shapes (hidden=32 -> lane-padded slow path), f32 input.
    batch, seq, hidden, mid = 2, 8, 32, 16
    kx, k1, k2, key = jax.random.split(key, 4)
    x = jax.random.normal(kx, (batch, seq, hidden), dtype=jnp.float32)
    params1 = init_adapter_params(k1, hidden, mid)    # submodel1
    params2 = init_adapter_params(k2, hidden, mid)    # submodel2
    out = jax.block_until_ready(combined_forward(x, params1, params2))
    ref = combined_ref(x.reshape(-1, hidden), params1, params2).reshape(x.shape)
    assert out.shape == x.shape
    assert out.dtype == jnp.bfloat16                   # ".half()" output (TPU-native half)
    assert jnp.allclose(out.astype(jnp.float32), ref, atol=2e-2, rtol=2e-2), "case1 mismatch"

    # Case 2: lane-aligned fast path (no activation pad/slice), bf16 input (2-byte reads),
    #         multi-step grid with a ragged last row tile (m=18, tile_m=8 -> 3 steps).
    batch, seq, hidden, mid = 2, 9, 128, 16
    kx, k1, k2, key = jax.random.split(key, 4)
    x = jax.random.normal(kx, (batch, seq, hidden), dtype=jnp.float32).astype(jnp.bfloat16)
    params1 = init_adapter_params(k1, hidden, mid)
    params2 = init_adapter_params(k2, hidden, mid)
    out = jax.block_until_ready(combined_forward(x, params1, params2, tile_m=8))
    ref = combined_ref(x.reshape(-1, hidden), params1, params2).reshape(x.shape)
    assert out.shape == x.shape
    assert out.dtype == jnp.bfloat16
    assert jnp.allclose(out.astype(jnp.float32), ref, atol=2e-2, rtol=2e-2), "case2 mismatch"

    print("KERNEL_OK")
</pallas_src>

<mosaic_0001>
module attributes {stable_mosaic.version = 11 : i64} {
  func.func @combined_adapter_kernel(%arg0: i32, %arg1: memref<16x128xf32, #tpu.memory_space<vmem>>, %arg2: memref<128x128xbf16, #tpu.memory_space<vmem>>, %arg3: memref<1x128xf32, #tpu.memory_space<vmem>>, %arg4: memref<128x128xbf16, #tpu.memory_space<vmem>>, %arg5: memref<1x128xf32, #tpu.memory_space<vmem>>, %arg6: memref<128x128xbf16, #tpu.memory_space<vmem>>, %arg7: memref<1x128xf32, #tpu.memory_space<vmem>>, %arg8: memref<128x128xbf16, #tpu.memory_space<vmem>>, %arg9: memref<1x128xf32, #tpu.memory_space<vmem>>, %arg10: memref<16x32xbf16, #tpu.memory_space<vmem>>) attributes {dimension_semantics = [#tpu.dimension_semantics<parallel>], iteration_bounds = array<i64: 1>, scalar_prefetch = 0 : i64, scratch_operands = 0 : i64, tpu.core_type = #tpu.core_type<tc>, window_params = [{transform_indices = @transform_0, window_bounds = array<i64: 16, 128>}, {pipeline_mode = #tpu.pipeline_mode<synchronous>, transform_indices = @transform_1, window_bounds = array<i64: 128, 128>}, {pipeline_mode = #tpu.pipeline_mode<synchronous>, transform_indices = @transform_2, window_bounds = array<i64: 1, 128>}, {pipeline_mode = #tpu.pipeline_mode<synchronous>, transform_indices = @transform_3, window_bounds = array<i64: 128, 128>}, {pipeline_mode = #tpu.pipeline_mode<synchronous>, transform_indices = @transform_4, window_bounds = array<i64: 1, 128>}, {pipeline_mode = #tpu.pipeline_mode<synchronous>, transform_indices = @transform_5, window_bounds = array<i64: 128, 128>}, {pipeline_mode = #tpu.pipeline_mode<synchronous>, transform_indices = @transform_6, window_bounds = array<i64: 1, 128>}, {pipeline_mode = #tpu.pipeline_mode<synchronous>, transform_indices = @transform_7, window_bounds = array<i64: 128, 128>}, {pipeline_mode = #tpu.pipeline_mode<synchronous>, transform_indices = @transform_8, window_bounds = array<i64: 1, 128>}, {transform_indices = @transform_9, window_bounds = array<i64: 16, 32>}]} {
    %c0 = arith.constant 0 : index
    %c0_0 = arith.constant 0 : index
    %0 = vector.load %arg1[%c0, %c0_0] : memref<16x128xf32, #tpu.memory_space<vmem>>, vector<16x128xf32>
    %1 = arith.truncf %0 : vector<16x128xf32> to vector<16x128xbf16>
    %c0_1 = arith.constant 0 : index
    %c0_2 = arith.constant 0 : index
    %2 = vector.load %arg2[%c0_1, %c0_2] : memref<128x128xbf16, #tpu.memory_space<vmem>>, vector<128x128xbf16>
    %cst = arith.constant dense<0.000000e+00> : vector<16x128xf32>
    %3 = tpu.matmul %1, %2, %cst {dimension_numbers = #tpu.dot_dimension_numbers<[1], [0], [0], [1], [0, 0, 1, 1], [], []>} : vector<16x128xbf16>, vector<128x128xbf16>, vector<16x128xf32> -> vector<16x128xf32>
    %c0_3 = arith.constant 0 : index
    %c0_4 = arith.constant 0 : index
    %4 = vector.load %arg3[%c0_3, %c0_4] : memref<1x128xf32, #tpu.memory_space<vmem>>, vector<1x128xf32>
    %5 = vector.broadcast %4 : vector<1x128xf32> to vector<16x128xf32>
    %6 = arith.addf %3, %5 : vector<16x128xf32>
    %cst_5 = arith.constant 0.000000e+00 : f32
    %7 = vector.broadcast %cst_5 : f32 to vector<16x128xf32>
    %8 = arith.maximumf %6, %7 : vector<16x128xf32>
    %9 = arith.truncf %8 : vector<16x128xf32> to vector<16x128xbf16>
    %c0_6 = arith.constant 0 : index
    %c0_7 = arith.constant 0 : index
    %10 = vector.load %arg4[%c0_6, %c0_7] : memref<128x128xbf16, #tpu.memory_space<vmem>>, vector<128x128xbf16>
    %cst_8 = arith.constant dense<0.000000e+00> : vector<16x128xf32>
    %11 = tpu.matmul %9, %10, %cst_8 {dimension_numbers = #tpu.dot_dimension_numbers<[1], [0], [0], [1], [0, 0, 1, 1], [], []>} : vector<16x128xbf16>, vector<128x128xbf16>, vector<16x128xf32> -> vector<16x128xf32>
    %c0_9 = arith.constant 0 : index
    %c0_10 = arith.constant 0 : index
    %12 = vector.load %arg5[%c0_9, %c0_10] : memref<1x128xf32, #tpu.memory_space<vmem>>, vector<1x128xf32>
    %13 = vector.broadcast %12 : vector<1x128xf32> to vector<16x128xf32>
    %14 = arith.addf %11, %13 : vector<16x128xf32>
    %15 = arith.addf %14, %0 : vector<16x128xf32>
    %16 = arith.truncf %15 : vector<16x128xf32> to vector<16x128xbf16>
    %c0_11 = arith.constant 0 : index
    %c0_12 = arith.constant 0 : index
    %17 = vector.load %arg6[%c0_11, %c0_12] : memref<128x128xbf16, #tpu.memory_space<vmem>>, vector<128x128xbf16>
    %cst_13 = arith.constant dense<0.000000e+00> : vector<16x128xf32>
    %18 = tpu.matmul %16, %17, %cst_13 {dimension_numbers = #tpu.dot_dimension_numbers<[1], [0], [0], [1], [0, 0, 1, 1], [], []>} : vector<16x128xbf16>, vector<128x128xbf16>, vector<16x128xf32> -> vector<16x128xf32>
    %c0_14 = arith.constant 0 : index
    %c0_15 = arith.constant 0 : index
    %19 = vector.load %arg7[%c0_14, %c0_15] : memref<1x128xf32, #tpu.memory_space<vmem>>, vector<1x128xf32>
    %20 = vector.broadcast %19 : vector<1x128xf32> to vector<16x128xf32>
    %21 = arith.addf %18, %20 : vector<16x128xf32>
    %cst_16 = arith.constant 0.000000e+00 : f32
    %22 = vector.broadcast %cst_16 : f32 to vector<16x128xf32>
    %23 = arith.maximumf %21, %22 : vector<16x128xf32>
    %24 = arith.truncf %23 : vector<16x128xf32> to vector<16x128xbf16>
    %c0_17 = arith.constant 0 : index
    %c0_18 = arith.constant 0 : index
    %25 = vector.load %arg8[%c0_17, %c0_18] : memref<128x128xbf16, #tpu.memory_space<vmem>>, vector<128x128xbf16>
    %cst_19 = arith.constant dense<0.000000e+00> : vector<16x128xf32>
    %26 = tpu.matmul %24, %25, %cst_19 {dimension_numbers = #tpu.dot_dimension_numbers<[1], [0], [0], [1], [0, 0, 1, 1], [], []>} : vector<16x128xbf16>, vector<128x128xbf16>, vector<16x128xf32> -> vector<16x128xf32>
    %c0_20 = arith.constant 0 : index
    %c0_21 = arith.constant 0 : index
    %27 = vector.load %arg9[%c0_20, %c0_21] : memref<1x128xf32, #tpu.memory_space<vmem>>, vector<1x128xf32>
    %28 = vector.broadcast %27 : vector<1x128xf32> to vector<16x128xf32>
    %29 = arith.addf %26, %28 : vector<16x128xf32>
    %30 = arith.addf %29, %15 : vector<16x128xf32>
    %31 = vector.extract_strided_slice %30 {offsets = [0, 0], sizes = [16, 32], strides = [1, 1]} : vector<16x128xf32> to vector<16x32xf32>
    %32 = arith.truncf %31 : vector<16x32xf32> to vector<16x32xbf16>
    %c0_22 = arith.constant 0 : index
    %c0_23 = arith.constant 0 : index
    %33 = vector.load %arg10[%c0_22, %c0_23] : memref<16x32xbf16, #tpu.memory_space<vmem>>, vector<16x32xbf16>
    tpu.vector_store %arg10[%c0_22, %c0_23], %32 {strides = array<i32>} : memref<16x32xbf16, #tpu.memory_space<vmem>>, vector<16x32xbf16>,
    return
  }
  func.func @transform_0(%arg0: i32) -> (i32, i32) {
    %c0_i32 = arith.constant 0 : i32
    %c0_i32_0 = arith.constant 0 : i32
    return %arg0, %c0_i32 : i32, i32
  }
  func.func @transform_1(%arg0: i32) -> (i32, i32) {
    %c0_i32 = arith.constant 0 : i32
    %c0_i32_0 = arith.constant 0 : i32
    %c0_i32_1 = arith.constant 0 : i32
    return %c0_i32, %c0_i32_0 : i32, i32
  }
  func.func @transform_2(%arg0: i32) -> (i32, i32) {
    %c0_i32 = arith.constant 0 : i32
    %c0_i32_0 = arith.constant 0 : i32
    %c0_i32_1 = arith.constant 0 : i32
    return %c0_i32, %c0_i32_0 : i32, i32
  }
  func.func @transform_3(%arg0: i32) -> (i32, i32) {
    %c0_i32 = arith.constant 0 : i32
    %c0_i32_0 = arith.constant 0 : i32
    %c0_i32_1 = arith.constant 0 : i32
    return %c0_i32, %c0_i32_0 : i32, i32
  }
  func.func @transform_4(%arg0: i32) -> (i32, i32) {
    %c0_i32 = arith.constant 0 : i32
    %c0_i32_0 = arith.constant 0 : i32
    %c0_i32_1 = arith.constant 0 : i32
    return %c0_i32, %c0_i32_0 : i32, i32
  }
  func.func @transform_5(%arg0: i32) -> (i32, i32) {
    %c0_i32 = arith.constant 0 : i32
    %c0_i32_0 = arith.constant 0 : i32
    %c0_i32_1 = arith.constant 0 : i32
    return %c0_i32, %c0_i32_0 : i32, i32
  }
  func.func @transform_6(%arg0: i32) -> (i32, i32) {
    %c0_i32 = arith.constant 0 : i32
    %c0_i32_0 = arith.constant 0 : i32
    %c0_i32_1 = arith.constant 0 : i32
    return %c0_i32, %c0_i32_0 : i32, i32
  }
  func.func @transform_7(%arg0: i32) -> (i32, i32) {
    %c0_i32 = arith.constant 0 : i32
    %c0_i32_0 = arith.constant 0 : i32
    %c0_i32_1 = arith.constant 0 : i32
    return %c0_i32, %c0_i32_0 : i32, i32
  }
  func.func @transform_8(%arg0: i32) -> (i32, i32) {
    %c0_i32 = arith.constant 0 : i32
    %c0_i32_0 = arith.constant 0 : i32
    %c0_i32_1 = arith.constant 0 : i32
    return %c0_i32, %c0_i32_0 : i32, i32
  }
  func.func @transform_9(%arg0: i32) -> (i32, i32) {
    %c0_i32 = arith.constant 0 : i32
    %c0_i32_0 = arith.constant 0 : i32
    return %arg0, %c0_i32 : i32, i32
  }
}

</mosaic_0001>

<bundles_post_ra>
// kernel: tpu_custom_call.1
= control target key start
LH: loop header
LB: loop body
LE: loop exit
PB: predicated region body
PF: predicated region fallthrough
CT: control target
= control target key end

     0   :  { %14 = vsyncpa [#allocation3], 0  ;;  %s1143_s0 = inlined_call_operand.hbm [shape: f32[16,128], index: 0, kind: input, shape index: {}]   ;;  %s1144_s1 = inlined_call_operand.hbm [shape: bf16[128,128], index: 1, kind: input, shape index: {}]   ;;  %s1145_s2 = inlined_call_operand.vmem [shape: f32[1,128], index: 2, kind: input, shape index: {}]   ;;  %s1146_s3 = inlined_call_operand.hbm [shape: bf16[128,128], index: 3, kind: input, shape index: {}]   ;;  %s1147_s4 = inlined_call_operand.vmem [shape: f32[1,128], index: 4, kind: input, shape index: {}]   ;;  %s1148_s5 = inlined_call_operand.hbm [shape: bf16[128,128], index: 5, kind: input, shape index: {}]   ;;  %s1149_s6 = inlined_call_operand.vmem [shape: f32[1,128], index: 6, kind: input, shape index: {}]   ;;  %s1150_s7 = inlined_call_operand.hbm [shape: bf16[128,128], index: 7, kind: input, shape index: {}]   ;;  %s1151_s8 = inlined_call_operand.vmem [shape: f32[1,128], index: 8, kind: input, shape index: {}]   ;;  %s1152_s9 = inlined_call_operand.hbm [shape: bf16[16,32], index: 9, kind: output, shape index: {}]  }
   0x1   :  { %15 = vsyncpa [#allocation6], 0 }
   0x2   :  { %16 = vsyncpa [#allocation9], 0 }
   0x3   :  { %17 = vsyncpa [#allocation4], 0  ;;  %s934_s30 = smov [#allocation5]   ;;  %s794_s13 = scalar_lea.hbm %s1144_s1, 1024 }
   0x4   :  { %s35_s10 = sshll.u32 %s934_s30, 4  ;;  %p795_p0 = scmp.ne.s32.totalorder %s1144_s1, %s794_s13  ;;  %s36_s10 = int_to_ptr.vmem [resolvable:$true] %s35_s10 }
   0x5   :  { %p798_p1 = scmp.lt.u32.totalorder %s794_s13, %s1144_s1 }
   0x7   :  { %p800_p2 = pnand %p798_p1, %p795_p0 }
   0x9   :  { %803 = shalt.err (!%p800_p2)
}
   0xa   :  { %s804_s18 = scalar_lea.vmem %s36_s10, 1024  ;;  %p809_p4 = scmp.lt.s32.totalorder %s36_s10, %s36_s10 }
   0xb   :  { %p805_p3 = scmp.ne.s32.totalorder %s36_s10, %s804_s18  ;;  %p810_p5 = scmp.lt.s32.totalorder %s804_s18, %s804_s18 }
   0xd   :  { %p811_p6 = por %p810_p5, %p809_p4 }
   0xf   :  { %p812_p7 = pnand %p811_p6, %p805_p3 }
  0x11   :  { %815 = shalt.err (!%p812_p7)
}
  0x12   :  { %s935_s19 = smov 64   ;;  %s936_s20 = smov 4  }
  0x13   :  { %41 = dma.hbm_to_vmem [thread:$0]  %s1144_s1, 1024, %s36_s10, [#allocation6], %s935_s19, %s935_s19, %s936_s20  }
  0x14   :  { %s937_s23 = smov [#allocation8]   ;;  %s938_s25 = smov [#allocation2]  }
  0x15   :  { %s63_s24 = sshll.u32 %s937_s23, 4  ;;  %s23_s26 = sshll.u32 %s938_s25, 4  ;;  %s64_s24 = int_to_ptr.vmem [resolvable:$true] %s63_s24  ;;  %s24_s26 = int_to_ptr.vmem [resolvable:$true] %s23_s26 }
  0x16   :  { %s816_s29 = scalar_lea.hbm %s1148_s5, 1024 }
  0x17   :  { %p817_p8 = scmp.ne.s32.totalorder %s1148_s5, %s816_s29  ;;  %p820_p9 = scmp.lt.u32.totalorder %s816_s29, %s1148_s5 }
  0x19   :  { %p822_p10 = pnand %p820_p9, %p817_p8 }
  0x1b   :  { %825 = shalt.err (!%p822_p10)
}
  0x1c   :  { %s826_s1 = scalar_lea.vmem %s64_s24, 1024  ;;  %p831_p12 = scmp.lt.s32.totalorder %s64_s24, %s64_s24 }
  0x1d   :  { %p827_p11 = scmp.ne.s32.totalorder %s64_s24, %s826_s1  ;;  %p832_p13 = scmp.lt.s32.totalorder %s826_s1, %s826_s1 }
  0x1f   :  { %p833_p0 = por %p832_p13, %p831_p12 }
  0x21   :  { %p834_p1 = pnand %p833_p0, %p827_p11 }
  0x23   :  { %837 = shalt.err (!%p834_p1)
}
  0x24   :  { %69 = dma.hbm_to_vmem [thread:$0]  %s1148_s5, 1024, %s64_s24, [#allocation9], %s935_s19, %s935_s19, %s936_s20  }
  0x25   :  { %s838_s17 = scalar_lea.hbm %s1143_s0, 256 }
  0x26   :  { %p839_p2 = scmp.ne.s32.totalorder %s1143_s0, %s838_s17  ;;  %p842_p3 = scmp.lt.u32.totalorder %s838_s17, %s1143_s0 }
  0x28   :  { %p844_p4 = pnand %p842_p3, %p839_p2 }
  0x2a   :  { %847 = shalt.err (!%p844_p4)
}
  0x2b   :  { %s848_s25 = scalar_lea.vmem %s24_s26, 256  ;;  %p853_p6 = scmp.lt.s32.totalorder %s24_s26, %s24_s26 }
  0x2c   :  { %p849_p5 = scmp.ne.s32.totalorder %s24_s26, %s848_s25  ;;  %p854_p7 = scmp.lt.s32.totalorder %s848_s25, %s848_s25 }
  0x2e   :  { %p855_p8 = por %p854_p7, %p853_p6 }
  0x30   :  { %p856_p9 = pnand %p855_p8, %p849_p5 }
  0x32   :  { %859 = shalt.err (!%p856_p9)
}
  0x33   :  { %s939_s5 = smov 128   ;;  %s940_s24 = smov 8  }
  0x34   :  { %29 = dma.hbm_to_vmem [thread:$0]  %s1143_s0, 256, %s24_s26, [#allocation3], %s939_s5, %s939_s5, %s940_s24  }
  0x35   :  { %s941_s29 = smov [#allocation7]   ;;  %s942_s11 = smov [#allocation10]  }
  0x36   :  { %s49_s30 = sshll.u32 %s941_s29, 4  ;;  %s77_s12 = sshll.u32 %s942_s11, 4  ;;  %s50_s30 = int_to_ptr.vmem [resolvable:$true] %s49_s30  ;;  %s78_s12 = int_to_ptr.vmem [resolvable:$true] %s77_s12 }
  0x37   :  { %s860_s10 = scalar_lea.hbm %s1146_s3, 1024 }
  0x38   :  { %p861_p10 = scmp.ne.s32.totalorder %s1146_s3, %s860_s10  ;;  %p864_p11 = scmp.lt.u32.totalorder %s860_s10, %s1146_s3 }
  0x3a   :  { %p866_p12 = pnand %p864_p11, %p861_p10 }
  0x3c   :  { %869 = shalt.err (!%p866_p12)
}
  0x3d   :  { %s870_s0 = scalar_lea.vmem %s50_s30, 1024  ;;  %p875_p0 = scmp.lt.s32.totalorder %s50_s30, %s50_s30 }
  0x3e   :  { %p871_p13 = scmp.ne.s32.totalorder %s50_s30, %s870_s0  ;;  %p876_p1 = scmp.lt.s32.totalorder %s870_s0, %s870_s0 }
  0x40   :  { %p877_p2 = por %p876_p1, %p875_p0 }
  0x42   :  { %p878_p3 = pnand %p877_p2, %p871_p13 }
  0x44   :  { %881 = shalt.err (!%p878_p3)
}
  0x45   :  { %55 = dma.hbm_to_vmem [thread:$0]  %s1146_s3, 1024, %s50_s30, [#allocation6], %s935_s19, %s935_s19, %s936_s20  }
  0x46   :  { %s882_s23 = scalar_lea.hbm %s1150_s7, 1024 }
  0x47   :  { %p883_p4 = scmp.ne.s32.totalorder %s1150_s7, %s882_s23  ;;  %p886_p5 = scmp.lt.u32.totalorder %s882_s23, %s1150_s7 }
  0x49   :  { %p888_p6 = pnand %p886_p5, %p883_p4 }
  0x4b   :  { %891 = shalt.err (!%p888_p6)
}
  0x4c   :  { %s892_s28 = scalar_lea.vmem %s78_s12, 1024  ;;  %p897_p8 = scmp.lt.s32.totalorder %s78_s12, %s78_s12 }
  0x4d   :  { %p893_p7 = scmp.ne.s32.totalorder %s78_s12, %s892_s28  ;;  %p898_p9 = scmp.lt.s32.totalorder %s892_s28, %s892_s28 }
  0x4f   :  { %p899_p10 = por %p898_p9, %p897_p8 }
  0x51   :  { %p900_p11 = pnand %p899_p10, %p893_p7 }
  0x53   :  { %903 = shalt.err (!%p900_p11)
}
  0x54   :  { %83 = dma.hbm_to_vmem [thread:$0]  %s1150_s7, 1024, %s78_s12, [#allocation9], %s935_s19, %s935_s19, %s936_s20  }
  0x55   :  { %926 = dma.done.wait [#allocation3], 256  }
  0x56   :  { %927 = vsyncadd [#allocation3], 4294967040 }
  0x57   :  { %928 = dma.done.wait [#allocation6], 2048  }
  0x58   :  { %929 = vsyncadd [#allocation6], 4294965248 }
  0x59   :  { %930 = dma.done.wait [#allocation9], 2048  }
  0x5a   :  { %931 = vsyncadd [#allocation9], 4294965248  ;;  %v943_v0 = vmov 0.0   ;;  %vm944_vm0 = vmmov 0   ;;  %v762_v1 = vld [vmem:[#allocation5] sm:$0xff]   ;;  %v763_v2 = vld [vmem:[#allocation5 + $0x8] sm:$0xff]  }
  0x5b   :  { %670 = vmatprep.subr.bf16.mxu0 %v943_v0  ;;  %686 = vmatprep.mubr.msk.bf16.mxu0 %vm944_vm0, %v943_v0  ;;  %v764_v3 = vld [vmem:[#allocation5 + $0x10] sm:$0xff]   ;;  %v770_v4 = vld [vmem:[#allocation7] sm:$0xff]   ;;  %v765_v5 = vld [vmem:[#allocation5 + $0x18] sm:$0xff]   ;;  %vm572_vm1 = vcmask 257024  }
  0x5c   :  { %690 = vmatprep.subr.bf16.mxu1 %v943_v0  ;;  %706 = vmatprep.mubr.msk.bf16.mxu1 %vm944_vm0, %v943_v0  ;;  %v771_v6 = vld [vmem:[#allocation7 + $0x8] sm:$0xff]   ;;  %v766_v7 = vld [vmem:[#allocation5 + $0x20] sm:$0xff]   ;;  %v772_v8 = vld [vmem:[#allocation7 + $0x10] sm:$0xff]  }
  0x5d   :  { %671 = vmatpush3.bf16.msra.mxu0 %v762_v1  ;;  %691 = vmatpush3.bf16.msra.mxu1 %v770_v4  ;;  %v767_v9 = vld [vmem:[#allocation5 + $0x28] sm:$0xff]   ;;  %v773_v10 = vld [vmem:[#allocation7 + $0x18] sm:$0xff]   ;;  %v768_v11 = vld [vmem:[#allocation5 + $0x30] sm:$0xff]  }
  0x5e   :  { %672 = vmatprep.subr.bf16.mxu0 %v943_v0  ;;  %692 = vmatprep.subr.bf16.mxu1 %v943_v0  ;;  %v774_v12 = vld [vmem:[#allocation7 + $0x20] sm:$0xff]   ;;  %v769_v13 = vld [vmem:[#allocation5 + $0x38] sm:$0xff]   ;;  %v1083_v14 = vld [vmem:[#allocation2] sm:$0xff] }
  0x5f   :  { %v1085_v15 = vld [vmem:[#allocation2 + $0x8] sm:$0xff]  ;;  %v775_v16 = vld [vmem:[#allocation7 + $0x28] sm:$0xff]   ;;  %v776_v18 = vld [vmem:[#allocation7 + $0x30] sm:$0xff]  }
  0x60   :  { %v104_v17 = vpack.c.bf16 %v1085_v15, %v1083_v14  ;;  %v777_v19 = vld [vmem:[#allocation7 + $0x38] sm:$0xff]   ;;  %v778_v20 = vld [vmem:[#allocation8] sm:$0xff]   ;;  %v779_v21 = vld [vmem:[#allocation8 + $0x8] sm:$0xff]  }
  0x61   :  { %673 = vmatpush3.bf16.msra.mxu0 %v763_v2  ;;  %693 = vmatpush3.bf16.msra.mxu1 %v771_v6  ;;  %v780_v22 = vld [vmem:[#allocation8 + $0x10] sm:$0xff]   ;;  %v781_v23 = vld [vmem:[#allocation8 + $0x18] sm:$0xff]   ;;  %v782_v24 = vld [vmem:[#allocation8 + $0x20] sm:$0xff]  }
  0x62   :  { %674 = vmatprep.subr.bf16.mxu0 %v943_v0  ;;  %694 = vmatprep.subr.bf16.mxu1 %v943_v0  ;;  %v783_v25 = vld [vmem:[#allocation8 + $0x28] sm:$0xff]   ;;  %v594_v26 = vld [vmem:[%s1145_s2] ss:$0 sm:$0xff]  ;;  %v785_v37 = vld [vmem:[#allocation8 + $0x38] sm:$0xff]  }
  0x63   :  { %v784_v36 = vld [vmem:[#allocation8 + $0x30] sm:$0xff]   ;;  %v786_v38 = vld [vmem:[#allocation10] sm:$0xff]   ;;  %v787_v39 = vld [vmem:[#allocation10 + $0x8] sm:$0xff]  }
  0x64   :  { %v788_v40 = vld [vmem:[#allocation10 + $0x10] sm:$0xff]   ;;  %v789_v41 = vld [vmem:[#allocation10 + $0x18] sm:$0xff]   ;;  %v790_v42 = vld [vmem:[#allocation10 + $0x20] sm:$0xff]  }
  0x65   :  { %675 = vmatpush3.bf16.msra.mxu0 %v764_v3  ;;  %695 = vmatpush3.bf16.msra.mxu1 %v772_v8  ;;  %v791_v43 = vld [vmem:[#allocation10 + $0x28] sm:$0xff]   ;;  %v603_v44 = vld [vmem:[%s1147_s4] ss:$0 sm:$0xff]  ;;  %v793_v55 = vld [vmem:[#allocation10 + $0x38] sm:$0xff]  }
  0x66   :  { %676 = vmatprep.subr.bf16.mxu0 %v943_v0  ;;  %696 = vmatprep.subr.bf16.mxu1 %v943_v0  ;;  %v792_v54 = vld [vmem:[#allocation10 + $0x30] sm:$0xff]  }
  0x67   :  { %v612_v56 = vld [vmem:[%s1149_s6] ss:$0 sm:$0xff]  ;;  %s945_s6 = smov [#allocation11]  }
  0x68   :  { %s580_s10 = sshll.u32 %s945_s6, 4  ;;  %s581_s10 = int_to_ptr.vmem [resolvable:$true] %s580_s10 }
  0x69   :  { %677 = vmatpush3.bf16.msra.mxu0 %v765_v5  ;;  %697 = vmatpush3.bf16.msra.mxu1 %v773_v10  ;;  %s904_s14 = scalar_lea.vmem %s581_s10, 128  ;;  %p909_p13 = scmp.lt.s32.totalorder %s581_s10, %s581_s10 }
  0x6a   :  { %678 = vmatprep.subr.bf16.mxu0 %v943_v0  ;;  %698 = vmatprep.subr.bf16.mxu1 %v943_v0  ;;  %p905_p12 = scmp.ne.s32.totalorder %s581_s10, %s904_s14  ;;  %p910_p0 = scmp.lt.s32.totalorder %s904_s14, %s904_s14 }
  0x6c   :  { %p911_p1 = por %p910_p0, %p909_p13 }
  0x6d   :  { %679 = vmatpush3.bf16.msra.mxu0 %v766_v7  ;;  %699 = vmatpush3.bf16.msra.mxu1 %v774_v12 }
  0x6e   :  { %680 = vmatprep.subr.bf16.mxu0 %v943_v0  ;;  %700 = vmatprep.subr.bf16.mxu1 %v943_v0  ;;  %p912_p2 = pnand %p911_p1, %p905_p12 }
  0x71   :  { %681 = vmatpush3.bf16.msra.mxu0 %v767_v9  ;;  %701 = vmatpush3.bf16.msra.mxu1 %v775_v16 }
  0x72   :  { %682 = vmatprep.subr.bf16.mxu0 %v943_v0  ;;  %702 = vmatprep.subr.bf16.mxu1 %v943_v0 }
  0x75   :  { %683 = vmatpush3.bf16.msra.mxu0 %v768_v11  ;;  %703 = vmatpush3.bf16.msra.mxu1 %v776_v18 }
  0x76   :  { %684 = vmatprep.subr.bf16.mxu0 %v943_v0  ;;  %704 = vmatprep.subr.bf16.mxu1 %v943_v0 }
  0x79   :  { %685 = vmatpush3.bf16.msra.mxu0 %v769_v13  ;;  %705 = vmatpush3.bf16.msra.mxu1 %v777_v19 }
  0x7a   :  { %710 = vmatprep.subr.bf16.mxu0 %v943_v0  ;;  %730 = vmatprep.subr.bf16.mxu1 %v943_v0 }
  0x7c   :  { %687 = vmatmul.mubr.bf16.vlgmr.msra.gmra.mrb[0].mxu0 %v104_v17 }
  0x7d   :  { %726 = vmatprep.mubr.msk.bf16.mxu0 %vm944_vm0, %v943_v0  ;;  %711 = vmatpush3.bf16.msra.mxu0 %v778_v20 }
  0x7e   :  { %712 = vmatprep.subr.bf16.mxu0 %v943_v0 }
  0x81   :  { %713 = vmatpush3.bf16.msra.mxu0 %v779_v21 }
  0x82   :  { %714 = vmatprep.subr.bf16.mxu0 %v943_v0 }
  0x85   :  { %715 = vmatpush3.bf16.msra.mxu0 %v780_v22 }
  0x86   :  { %716 = vmatprep.subr.bf16.mxu0 %v943_v0 }
  0x89   :  { %717 = vmatpush3.bf16.msra.mxu0 %v781_v23 }
  0x8a   :  { %718 = vmatprep.subr.bf16.mxu0 %v943_v0 }
  0x8d   :  { %719 = vmatpush3.bf16.msra.mxu0 %v782_v24 }
  0x8e   :  { %720 = vmatprep.subr.bf16.mxu0 %v943_v0 }
  0x91   :  { %721 = vmatpush3.bf16.msra.mxu0 %v783_v25 }
  0x92   :  { %722 = vmatprep.subr.bf16.mxu0 %v943_v0 }
  0x95   :  { %723 = vmatpush3.bf16.msra.mxu0 %v784_v36 }
  0x96   :  { %724 = vmatprep.subr.bf16.mxu0 %v943_v0 }
  0x99   :  { %725 = vmatpush3.bf16.msra.mxu0 %v785_v37 }
 0x14f   :  { %v210_v27 = vpop.f32.mrb[0].mxu0 }
 0x150   :  { %v211_v28 = vadd.f32 %v594_v26, %v210_v27  ;;  %v688_v29 = vpop.f32.mrb[1].mxu0 }
 0x151   :  { %v213_v30 = vpop.f32.mrb[2].mxu0 }
 0x152   :  { %v214_v31 = vadd.f32 %v594_v26, %v213_v30  ;;  %v689_v32 = vpop.f32.mrb[3].mxu0  ;;  %v217_v33 = vmax.f32 %v211_v28, 0.0 }
 0x154   :  { %v218_v34 = vmax.f32 %v214_v31, 0.0 }
 0x156   :  { %v219_v35 = vpack.c.bf16 %v218_v34, %v217_v33 }
 0x158   :  { %707 = vmatmul.mubr.bf16.vlgmr.msra.gmra.mrb[0].mxu1 %v219_v35 }
 0x159   :  { %746 = vmatprep.mubr.msk.bf16.mxu1 %vm944_vm0, %v943_v0  ;;  %731 = vmatpush3.bf16.msra.mxu1 %v786_v38 }
 0x15a   :  { %732 = vmatprep.subr.bf16.mxu1 %v943_v0 }
 0x15d   :  { %733 = vmatpush3.bf16.msra.mxu1 %v787_v39 }
 0x15e   :  { %734 = vmatprep.subr.bf16.mxu1 %v943_v0 }
 0x161   :  { %735 = vmatpush3.bf16.msra.mxu1 %v788_v40 }
 0x162   :  { %736 = vmatprep.subr.bf16.mxu1 %v943_v0 }
 0x165   :  { %737 = vmatpush3.bf16.msra.mxu1 %v789_v41 }
 0x166   :  { %738 = vmatprep.subr.bf16.mxu1 %v943_v0 }
 0x169   :  { %739 = vmatpush3.bf16.msra.mxu1 %v790_v42 }
 0x16a   :  { %740 = vmatprep.subr.bf16.mxu1 %v943_v0 }
 0x16d   :  { %741 = vmatpush3.bf16.msra.mxu1 %v791_v43 }
 0x16e   :  { %742 = vmatprep.subr.bf16.mxu1 %v943_v0 }
 0x171   :  { %743 = vmatpush3.bf16.msra.mxu1 %v792_v54 }
 0x172   :  { %744 = vmatprep.subr.bf16.mxu1 %v943_v0  ;;  %v621_v0 = vld [vmem:[%s1151_s8] ss:$0 sm:$0xff] }
 0x175   :  { %745 = vmatpush3.bf16.msra.mxu1 %v793_v55 }
 0x22b   :  { %v325_v45 = vpop.f32.mrb[0].mxu1 }
 0x22c   :  { %v326_v46 = vadd.f32 %v603_v44, %v325_v45  ;;  %v708_v47 = vpop.f32.mrb[1].mxu1 }
 0x22d   :  { %v328_v48 = vpop.f32.mrb[2].mxu1 }
 0x22e   :  { %v329_v49 = vadd.f32 %v603_v44, %v328_v48  ;;  %v709_v50 = vpop.f32.mrb[3].mxu1  ;;  %v332_v51 = vadd.f32 %v326_v46, %v1083_v14 }
 0x230   :  { %v333_v52 = vadd.f32 %v329_v49, %v1085_v15 }
 0x232   :  { %v334_v53 = vpack.c.bf16 %v333_v52, %v332_v51 }
 0x234   :  { %727 = vmatmul.mubr.bf16.vlgmr.msra.gmra.mrb[4].mxu0 %v334_v53 }
 0x307   :  { %v440_v57 = vpop.f32.mrb[4].mxu0 }
 0x308   :  { %v441_v58 = vadd.f32 %v612_v56, %v440_v57  ;;  %v728_v59 = vpop.f32.mrb[5].mxu0 }
 0x309   :  { %v443_v60 = vpop.f32.mrb[6].mxu0 }
 0x30a   :  { %v444_v61 = vadd.f32 %v612_v56, %v443_v60  ;;  %v729_v62 = vpop.f32.mrb[7].mxu0  ;;  %v447_v63 = vmax.f32 %v441_v58, 0.0 }
 0x30c   :  { %v448_v1 = vmax.f32 %v444_v61, 0.0 }
 0x30e   :  { %v449_v2 = vpack.c.bf16 %v448_v1, %v447_v63 }
 0x310   :  { %747 = vmatmul.mubr.bf16.vlgmr.msra.gmra.mrb[4].mxu1 %v449_v2 }
 0x3e3   :  { %v555_v3 = vpop.f32.mrb[4].mxu1 }
 0x3e4   :  { %v556_v4 = vadd.f32 %v621_v0, %v555_v3  ;;  %v748_v5 = vpop.f32.mrb[5].mxu1 }
 0x3e5   :  { %v558_v6 = vpop.f32.mrb[6].mxu1 }
 0x3e6   :  { %v562_v7 = vadd.f32 %v556_v4, %v332_v51  ;;  %v559_v8 = vadd.f32 %v621_v0, %v558_v6  ;;  %v749_v9 = vpop.f32.mrb[7].mxu1 }
 0x3e8   :  { %v632_v10 = vpack.c.bf16 %v562_v7, %v562_v7  ;;  %v563_v11 = vadd.f32 %v559_v8, %v333_v52 }
 0x3ea   :  { %v633_v12 = vpack.c.bf16 %v563_v11, %v563_v11  ;;  %573 = vst.msk [vmem:[#allocation11] sm:$0xf] %vm572_vm1, %v632_v10 }
 0x3ec   :  { %574 = vst.msk [vmem:[#allocation11 + $0x4] sm:$0xf] %vm572_vm1, %v633_v12 }
 0x3ed   :  { %915 = shalt.err (!%p912_p2)
}
 0x3ee   :  { %s916_s16 = scalar_lea.hbm %s1152_s9, 128 }
 0x3ef   :  { %p917_p3 = scmp.ne.s32.totalorder %s1152_s9, %s916_s16  ;;  %p920_p4 = scmp.lt.u32.totalorder %s916_s16, %s1152_s9 }
 0x3f1   :  { %p922_p5 = pnand %p920_p4, %p917_p3 }
 0x3f3   :  { %925 = shalt.err (!%p922_p5)
}
 0x3f4   :  { %586 = dma.vmem_to_hbm [thread:$0]  %s581_s10, 128, %s1152_s9, [#allocation4], %s935_s19, %s935_s19, %s936_s20  }
 0x3f5   :  { %932 = dma.done.wait [#allocation4], 128  }
 0x3f6   :  { %933 = vsyncadd [#allocation4], 4294967168 }
 0x3f7   :  { %590 = vsyncpa [#allocation3], 1 }
 0x3f8   :  { %591 = vsyncpa [#allocation6], 1 }
 0x3f9   :  { %592 = vsyncpa [#allocation9], 1 }
 0x3fa   :  { %593 = vsyncpa [#allocation4], 1 }

</bundles_post_ra>
